<compile_context>
chip_gen: v6e
topology: v6e:2x2x1
jax: 0.10.0
libtpu: 0.0.40
codegen_flags: <defaults>
</compile_context>

<pallas_src>
import functools

import jax
import jax.numpy as jnp
from jax.experimental import pallas as pl
from jax.experimental.pallas import tpu as pltpu


def _round_up(v, m):
    return (v + m - 1) // m * m


def _cdiv(a, b):
    return -(-a // b)


def _vmem_capacity_bytes():
    """Physical VMEM per TensorCore; conservative 64 MiB (v7x) fallback."""
    try:
        info = pltpu.get_tpu_info()
        cap = int(getattr(info, "vmem_capacity_bytes", 0) or 0)
        if cap > 0:
            return cap
    except Exception:
        pass
    return 64 << 20


# ---------------------------------------------------------------------------
# Kernels
# ---------------------------------------------------------------------------
def mlp_kernel_fused(x_ref, w1_ref, b1_ref, w2_ref, b2_ref, o_ref):
    """Whole hidden dim resident. Grid = (batch tiles,) [parallel].

    W1/W2/b1/b2 have constant block indices -> stay resident in VMEM for the
    whole kernel; only x/out tiles stream per grid step. Writes straight to
    o_ref (no scratch, no finalize copy)."""
    h = jnp.dot(x_ref[...], w1_ref[...], preferred_element_type=jnp.float32)
    h = jnp.maximum(h + b1_ref[...].astype(jnp.float32), 0.0)   # f32 on VPU
    out = jnp.dot(h.astype(w2_ref.dtype), w2_ref[...],
                  preferred_element_type=jnp.float32)
    out = out + b2_ref[...].astype(jnp.float32)
    o_ref[...] = out.astype(o_ref.dtype)


def mlp_kernel_ktiled(x_ref, w1_ref, b1_ref, w2_ref, b2_ref, o_ref, acc_ref):
    """Hidden dim K-tiled. Grid = (batch tiles [parallel], K [arbitrary])."""
    k = pl.program_id(1)

    @pl.when(k == 0)
    def _init():
        # Fold the second bias into the accumulator init.
        acc_ref[...] = jnp.broadcast_to(
            b2_ref[...].astype(jnp.float32), acc_ref.shape)

    h = jnp.dot(x_ref[...], w1_ref[...], preferred_element_type=jnp.float32)
    h = jnp.maximum(h + b1_ref[...].astype(jnp.float32), 0.0)
    acc_ref[...] += jnp.dot(h.astype(w2_ref.dtype), w2_ref[...],
                            preferred_element_type=jnp.float32)

    @pl.when(k == pl.num_programs(1) - 1)
    def _finalize():
        o_ref[...] = acc_ref[...].astype(o_ref.dtype)


# ---------------------------------------------------------------------------
# Tiling plan (pure-Python statics, generation-aware VMEM budget)
# ---------------------------------------------------------------------------
def _plan(B, E_p, H_p, cb, ob):
    cap = _vmem_capacity_bytes()
    # ~96-100 MiB on v5e/v6e (128 MiB physical), ~48 MiB on v7x (64 MiB).
    budget = max(min(cap - (16 << 20), int(cap * 0.75)), 24 << 20)
    headroom = 4 << 20

    # Batch tile: minimize padding (B=300 -> 2 tiles of 152, not 512).
    n_bt = max(1, _cdiv(B, 256))
    block_m = _round_up(_cdiv(B, n_bt), 8)
    # Megacore (v7x has 2 TCs): guarantee >=2 batch tiles when B is big enough.
    if _cdiv(B, block_m) < 2 and B >= 16:
        block_m = _round_up(_cdiv(B, 2), 8)

    def est_fused(bm):
        return (2 * bm * E_p * cb              # x tile (double buffered)
                + 2 * E_p * H_p * cb           # W1 (conservative 2x)
                + 2 * H_p * E_p * cb           # W2
                + 2 * H_p * 4 + 2 * E_p * 4    # biases (f32)
                + 2 * bm * E_p * ob            # out tile
                + bm * H_p * 4                 # h intermediate (f32)
                + bm * H_p * cb                # h cast for 2nd MXU operand
                + bm * E_p * 4                 # out f32 temp
                + headroom)

    def est_ktiled(bm, bh):
        return (2 * bm * E_p * cb
                + 2 * E_p * bh * cb            # W1 K-tile
                + 2 * bh * E_p * cb            # W2 K-tile
                + 2 * bh * 4 + 2 * E_p * 4
                + 2 * bm * E_p * ob
                + bm * E_p * 4                 # f32 accumulator scratch
                + bm * bh * 4 + bm * bh * cb   # h + cast copy
                + headroom)

    while True:
        if est_fused(block_m) <= budget:
            mode, block_h, est = "fused", H_p, est_fused(block_m)
            break
        # Largest block_h (multiple of 128 that divides H_p) fitting budget.
        m = H_p // 128
        best_bh = None
        for d in range(m, 0, -1):
            if m % d:
                continue
            bh = 128 * d
            if est_ktiled(block_m, bh) <= budget:
                best_bh = bh
                break
        if best_bh is not None:
            mode, block_h, est = "ktiled", best_bh, est_ktiled(block_m, best_bh)
            break
        if block_m <= 8:
            # Last resort: smallest tiles (extreme E only).
            # TODO(synk): add an output-E tile (extra parallel grid axis) for
            # E_p >~ 8K on v7x so acc/x/out stop scaling with full E.
            mode, block_m, block_h = "ktiled", 8, 128
            est = est_ktiled(8, 128)
            break
        block_m = max(8, _round_up(block_m // 2, 8))

    vmem_limit = int(min(cap - (8 << 20), max(est, 32 << 20)))
    return mode, block_m, block_h, vmem_limit


# ---------------------------------------------------------------------------
# Forward (jitted; weights arrive already padded/cast)
# ---------------------------------------------------------------------------
@functools.partial(jax.jit, static_argnames=("E",))
def _mlp_forward_padded(x, w1p, b1p, w2p, b2p, *, E):
    B = x.shape[0]
    E_p, H_p = w1p.shape
    compute_dtype = w1p.dtype
    out_dtype = x.dtype
    cb = jnp.dtype(compute_dtype).itemsize
    ob = jnp.dtype(out_dtype).itemsize

    mode, block_m, block_h, vmem_limit = _plan(B, E_p, H_p, cb, ob)
    B_p = _round_up(B, block_m)
    n_bt = B_p // block_m

    # Only x is padded/cast per call; weights were prepared once in make_mlp.
    xp = jnp.pad(x, ((0, B_p - B), (0, E_p - E))).astype(compute_dtype)

    cost = pl.CostEstimate(
        flops=4 * B_p * E_p * H_p,
        transcendentals=0,
        bytes_accessed=int(xp.size * cb + w1p.size * cb + w2p.size * cb
                           + b1p.size * 4 + b2p.size * 4 + B_p * E_p * ob),
    )

    if mode == "fused":
        out_p = pl.pallas_call(
            mlp_kernel_fused,
            out_shape=jax.ShapeDtypeStruct((B_p, E_p), out_dtype),
            grid_spec=pltpu.PrefetchScalarGridSpec(
                num_scalar_prefetch=0,
                grid=(n_bt,),
                in_specs=[
                    pl.BlockSpec((block_m, E_p), lambda i: (i, 0)),   # x
                    pl.BlockSpec((E_p, H_p), lambda i: (0, 0)),       # W1
                    pl.BlockSpec((1, H_p), lambda i: (0, 0)),         # b1
                    pl.BlockSpec((H_p, E_p), lambda i: (0, 0)),       # W2
                    pl.BlockSpec((1, E_p), lambda i: (0, 0)),         # b2
                ],
                out_specs=pl.BlockSpec((block_m, E_p), lambda i: (i, 0)),
            ),
            compiler_params=pltpu.CompilerParams(
                dimension_semantics=("parallel",),
                vmem_limit_bytes=vmem_limit,
            ),
            cost_estimate=cost,
        )(xp, w1p, b1p, w2p, b2p)
    else:
        n_kt = H_p // block_h
        out_p = pl.pallas_call(
            mlp_kernel_ktiled,
            out_shape=jax.ShapeDtypeStruct((B_p, E_p), out_dtype),
            grid_spec=pltpu.PrefetchScalarGridSpec(
                num_scalar_prefetch=0,
                grid=(n_bt, n_kt),
                in_specs=[
                    pl.BlockSpec((block_m, E_p), lambda i, k: (i, 0)),   # x
                    pl.BlockSpec((E_p, block_h), lambda i, k: (0, k)),   # W1
                    pl.BlockSpec((1, block_h), lambda i, k: (0, k)),     # b1
                    pl.BlockSpec((block_h, E_p), lambda i, k: (k, 0)),   # W2
                    pl.BlockSpec((1, E_p), lambda i, k: (0, 0)),         # b2
                ],
                out_specs=pl.BlockSpec((block_m, E_p), lambda i, k: (i, 0)),
                scratch_shapes=[pltpu.VMEM((block_m, E_p), jnp.float32)],
            ),
            compiler_params=pltpu.CompilerParams(
                dimension_semantics=("parallel", "arbitrary"),
                vmem_limit_bytes=vmem_limit,
            ),
            cost_estimate=cost,
        )(xp, w1p, b1p, w2p, b2p)

    return out_p[:B, :E]


def make_mlp(w1, b1, w2, b2, *, compute_dtype=None):
    """Prepare (pad + cast) the MLP parameters once; return x -> MLP(x).

    w1: (E, H), b1: (H,), w2: (H, E), b2: (E,) — weights pre-transposed
    relative to nn.Linear so the kernel computes x @ W + b directly.
    compute_dtype=bfloat16 halves MXU-operand / HBM traffic on v5e/v6e/v7x
    (accumulation and bias/ReLU stay f32)."""
    E, H = w1.shape
    if compute_dtype is None:
        compute_dtype = w1.dtype
    E_p = _round_up(E, 128)   # lane-dense feature dim
    H_p = _round_up(H, 128)   # lane-dense hidden dim

    w1p = jnp.pad(w1, ((0, E_p - E), (0, H_p - H))).astype(compute_dtype)
    w2p = jnp.pad(w2, ((0, H_p - H), (0, E_p - E))).astype(compute_dtype)
    b1p = jnp.pad(b1, (0, H_p - H)).astype(jnp.float32).reshape(1, H_p)
    b2p = jnp.pad(b2, (0, E_p - E)).astype(jnp.float32).reshape(1, E_p)
    w1p, b1p, w2p, b2p = jax.block_until_ready(
        jax.device_put((w1p, b1p, w2p, b2p)))

    def forward(x):
        return _mlp_forward_padded(x, w1p, b1p, w2p, b2p, E=E)

    return forward


def reference_mlp(x, w1, b1, w2, b2):
    h = jnp.maximum(x @ w1 + b1, 0.0)
    return h @ w2 + b2


if __name__ == "__main__":
    # Small shapes consistent with the module's forward: (batch, embedding_dim)
    batch = 8
    embedding_dim = 32
    hidden_dim = 64

    key = jax.random.PRNGKey(0)
    kx, kw1, kb1, kw2, kb2 = jax.random.split(key, 5)

    x = jax.random.normal(kx, (batch, embedding_dim), dtype=jnp.float32)

    # Deterministic init mimicking nn.Linear's uniform(-1/sqrt(fan_in), ...).
    lim1 = 1.0 / (embedding_dim ** 0.5)
    lim2 = 1.0 / (hidden_dim ** 0.5)
    # Stored pre-transposed: (in_features, out_features)
    w1 = jax.random.uniform(kw1, (embedding_dim, hidden_dim),
                            minval=-lim1, maxval=lim1, dtype=jnp.float32)
    b1 = jax.random.uniform(kb1, (hidden_dim,),
                            minval=-lim1, maxval=lim1, dtype=jnp.float32)
    w2 = jax.random.uniform(kw2, (hidden_dim, embedding_dim),
                            minval=-lim2, maxval=lim2, dtype=jnp.float32)
    b2 = jax.random.uniform(kb2, (embedding_dim,),
                            minval=-lim2, maxval=lim2, dtype=jnp.float32)

    ref = reference_mlp(x, w1, b1, w2, b2)

    # f32 path.
    mlp_f32 = make_mlp(w1, b1, w2, b2)
    out = jax.block_until_ready(mlp_f32(x))
    assert out.shape == (batch, embedding_dim)
    assert jnp.allclose(out, ref, atol=1e-5, rtol=1e-5), "f32 mismatch vs reference"

    # Larger batch exercises multi-batch-tile + batch-padding path.
    xb = jax.random.normal(kx, (300, embedding_dim), dtype=jnp.float32)
    refb = reference_mlp(xb, w1, b1, w2, b2)
    outb = jax.block_until_ready(mlp_f32(xb))
    assert outb.shape == (300, embedding_dim)
    assert jnp.allclose(outb, refb, atol=1e-5, rtol=1e-5), "multi-tile mismatch"

    # bf16 MXU-operand path (valid on v5e/v6e/v7x): f32 accumulation, looser
    # tolerance because activations (not just weights) are cast to bf16.
    mlp_bf16 = make_mlp(w1, b1, w2, b2, compute_dtype=jnp.bfloat16)
    out_bf16 = jax.block_until_ready(mlp_bf16(x))
    assert jnp.allclose(out_bf16, ref, atol=2e-2, rtol=2e-2), "bf16 mismatch vs reference"

    print("KERNEL_OK")
</pallas_src>

<mosaic_0001>
module attributes {stable_mosaic.version = 11 : i64} {
  func.func @mlp_kernel_fused(%arg0: i32, %arg1: memref<8x128xf32, #tpu.memory_space<vmem>>, %arg2: memref<128x128xf32, #tpu.memory_space<vmem>>, %arg3: memref<1x128xf32, #tpu.memory_space<vmem>>, %arg4: memref<128x128xf32, #tpu.memory_space<vmem>>, %arg5: memref<1x128xf32, #tpu.memory_space<vmem>>, %arg6: memref<8x128xf32, #tpu.memory_space<vmem>>) attributes {dimension_semantics = [#tpu.dimension_semantics<parallel>], iteration_bounds = array<i64: 1>, scalar_prefetch = 0 : i64, scratch_operands = 0 : i64, tpu.core_type = #tpu.core_type<tc>, window_params = [{transform_indices = @transform_0, window_bounds = array<i64: 8, 128>}, {pipeline_mode = #tpu.pipeline_mode<synchronous>, transform_indices = @transform_1, window_bounds = array<i64: 128, 128>}, {pipeline_mode = #tpu.pipeline_mode<synchronous>, transform_indices = @transform_2, window_bounds = array<i64: 1, 128>}, {pipeline_mode = #tpu.pipeline_mode<synchronous>, transform_indices = @transform_3, window_bounds = array<i64: 128, 128>}, {pipeline_mode = #tpu.pipeline_mode<synchronous>, transform_indices = @transform_4, window_bounds = array<i64: 1, 128>}, {transform_indices = @transform_5, window_bounds = array<i64: 8, 128>}]} {
    %c0 = arith.constant 0 : index
    %c0_0 = arith.constant 0 : index
    %0 = vector.load %arg1[%c0, %c0_0] : memref<8x128xf32, #tpu.memory_space<vmem>>, vector<8x128xf32>
    %c0_1 = arith.constant 0 : index
    %c0_2 = arith.constant 0 : index
    %1 = vector.load %arg2[%c0_1, %c0_2] : memref<128x128xf32, #tpu.memory_space<vmem>>, vector<128x128xf32>
    %cst = arith.constant dense<0.000000e+00> : vector<8x128xf32>
    %2 = tpu.matmul %0, %1, %cst {dimension_numbers = #tpu.dot_dimension_numbers<[1], [0], [0], [1], [0, 0, 1, 1], [], []>} : vector<8x128xf32>, vector<128x128xf32>, vector<8x128xf32> -> vector<8x128xf32>
    %c0_3 = arith.constant 0 : index
    %c0_4 = arith.constant 0 : index
    %3 = vector.load %arg3[%c0_3, %c0_4] : memref<1x128xf32, #tpu.memory_space<vmem>>, vector<1x128xf32>
    %4 = vector.broadcast %3 : vector<1x128xf32> to vector<8x128xf32>
    %5 = arith.addf %2, %4 : vector<8x128xf32>
    %cst_5 = arith.constant 0.000000e+00 : f32
    %6 = vector.broadcast %cst_5 : f32 to vector<8x128xf32>
    %7 = arith.maximumf %5, %6 : vector<8x128xf32>
    %c0_6 = arith.constant 0 : index
    %c0_7 = arith.constant 0 : index
    %8 = vector.load %arg4[%c0_6, %c0_7] : memref<128x128xf32, #tpu.memory_space<vmem>>, vector<128x128xf32>
    %cst_8 = arith.constant dense<0.000000e+00> : vector<8x128xf32>
    %9 = tpu.matmul %7, %8, %cst_8 {dimension_numbers = #tpu.dot_dimension_numbers<[1], [0], [0], [1], [0, 0, 1, 1], [], []>} : vector<8x128xf32>, vector<128x128xf32>, vector<8x128xf32> -> vector<8x128xf32>
    %c0_9 = arith.constant 0 : index
    %c0_10 = arith.constant 0 : index
    %10 = vector.load %arg5[%c0_9, %c0_10] : memref<1x128xf32, #tpu.memory_space<vmem>>, vector<1x128xf32>
    %11 = vector.broadcast %10 : vector<1x128xf32> to vector<8x128xf32>
    %12 = arith.addf %9, %11 : vector<8x128xf32>
    %c0_11 = arith.constant 0 : index
    %c0_12 = arith.constant 0 : index
    %13 = vector.load %arg6[%c0_11, %c0_12] : memref<8x128xf32, #tpu.memory_space<vmem>>, vector<8x128xf32>
    tpu.vector_store %arg6[%c0_11, %c0_12], %12 {strides = array<i32>} : memref<8x128xf32, #tpu.memory_space<vmem>>, vector<8x128xf32>,
    return
  }
  func.func @transform_0(%arg0: i32) -> (i32, i32) {
    %c0_i32 = arith.constant 0 : i32
    %c0_i32_0 = arith.constant 0 : i32
    return %arg0, %c0_i32 : i32, i32
  }
  func.func @transform_1(%arg0: i32) -> (i32, i32) {
    %c0_i32 = arith.constant 0 : i32
    %c0_i32_0 = arith.constant 0 : i32
    %c0_i32_1 = arith.constant 0 : i32
    return %c0_i32, %c0_i32_0 : i32, i32
  }
  func.func @transform_2(%arg0: i32) -> (i32, i32) {
    %c0_i32 = arith.constant 0 : i32
    %c0_i32_0 = arith.constant 0 : i32
    %c0_i32_1 = arith.constant 0 : i32
    return %c0_i32, %c0_i32_0 : i32, i32
  }
  func.func @transform_3(%arg0: i32) -> (i32, i32) {
    %c0_i32 = arith.constant 0 : i32
    %c0_i32_0 = arith.constant 0 : i32
    %c0_i32_1 = arith.constant 0 : i32
    return %c0_i32, %c0_i32_0 : i32, i32
  }
  func.func @transform_4(%arg0: i32) -> (i32, i32) {
    %c0_i32 = arith.constant 0 : i32
    %c0_i32_0 = arith.constant 0 : i32
    %c0_i32_1 = arith.constant 0 : i32
    return %c0_i32, %c0_i32_0 : i32, i32
  }
  func.func @transform_5(%arg0: i32) -> (i32, i32) {
    %c0_i32 = arith.constant 0 : i32
    %c0_i32_0 = arith.constant 0 : i32
    return %arg0, %c0_i32 : i32, i32
  }
}

</mosaic_0001>

<bundles_post_ra>
// kernel: _mlp_forward_padded.1
= control target key start
LH: loop header
LB: loop body
LE: loop exit
PB: predicated region body
PF: predicated region fallthrough
CT: control target
= control target key end

     0   :  { %10 = vsyncpa [#allocation3], 0  ;;  %s522_s0 = inlined_call_operand.vmem [shape: f32[8,128], index: 0, kind: input, shape index: {}]   ;;  %s523_s1 = inlined_call_operand.hbm [shape: f32[128,128], index: 1, kind: input, shape index: {}]   ;;  %s524_s2 = inlined_call_operand.vmem [shape: f32[1,128], index: 2, kind: input, shape index: {}]   ;;  %s525_s3 = inlined_call_operand.hbm [shape: f32[128,128], index: 3, kind: input, shape index: {}]   ;;  %s526_s4 = inlined_call_operand.vmem [shape: f32[1,128], index: 4, kind: input, shape index: {}]   ;;  %s527_s5 = inlined_call_operand.hbm [shape: f32[8,128], index: 5, kind: output, shape index: {}]  }
   0x1   :  { %11 = vsyncpa [#allocation6], 0 }
   0x2   :  { %12 = vsyncpa [#allocation4], 0  ;;  %s433_s18 = smov [#allocation2]  }
   0x3   :  { %s20_s19 = sshll.u32 %s433_s18, 4  ;;  %s21_s19 = int_to_ptr.vmem [resolvable:$true] %s20_s19 }
   0x4   :  { %s375_s20 = scalar_lea.vmem %s21_s19, 2048  ;;  %p380_p1 = scmp.lt.s32.totalorder %s21_s19, %s21_s19 }
   0x5   :  { %p376_p0 = scmp.ne.s32.totalorder %s21_s19, %s375_s20  ;;  %p381_p2 = scmp.lt.s32.totalorder %s375_s20, %s375_s20 }
   0x7   :  { %p382_p3 = por %p381_p2, %p380_p1 }
   0x9   :  { %p383_p4 = pnand %p382_p3, %p376_p0 }
   0xb   :  { %386 = shalt.err (!%p383_p4)
}
   0xc   :  { %s434_s21 = smov 128   ;;  %s435_s22 = smov 8  }
   0xd   :  { %26 = dma.hbm_to_vmem [thread:$0]  %s523_s1, 2048, %s21_s19, [#allocation3], %s434_s21, %s434_s21, %s435_s22  }
   0xe   :  { %s436_s25 = smov [#allocation5]  }
   0xf   :  { %s34_s26 = sshll.u32 %s436_s25, 4  ;;  %s35_s26 = int_to_ptr.vmem [resolvable:$true] %s34_s26 }
  0x10   :  { %s395_s27 = scalar_lea.vmem %s35_s26, 2048  ;;  %p400_p6 = scmp.lt.s32.totalorder %s35_s26, %s35_s26 }
  0x11   :  { %p396_p5 = scmp.ne.s32.totalorder %s35_s26, %s395_s27  ;;  %p401_p7 = scmp.lt.s32.totalorder %s395_s27, %s395_s27 }
  0x13   :  { %p402_p8 = por %p401_p7, %p400_p6 }
  0x15   :  { %p403_p9 = pnand %p402_p8, %p396_p5 }
  0x17   :  { %406 = shalt.err (!%p403_p9)
}
  0x18   :  { %40 = dma.hbm_to_vmem [thread:$0]  %s525_s3, 2048, %s35_s26, [#allocation6], %s434_s21, %s434_s21, %s435_s22  }
  0x19   :  { %427 = dma.done.wait [#allocation3], 2048  }
  0x1a   :  { %428 = vsyncadd [#allocation3], 4294965248 }
  0x1b   :  { %429 = dma.done.wait [#allocation6], 2048  }
  0x1c   :  { %430 = vsyncadd [#allocation6], 4294965248  ;;  %v437_v0 = vmov 0.0   ;;  %vm438_vm0 = vmmov 0   ;;  %v65_v1 = vld [vmem:[#allocation2 + $0x78] sm:$0xff]  ;;  %v64_v2 = vld [vmem:[#allocation2 + $0x70] sm:$0xff] }
  0x1d   :  { %290 = vmatprep.subr.mxu0 %v437_v0  ;;  %322 = vmatprep.mubr.msk.f32.mxu0 %vm438_vm0, %v437_v0  ;;  %v63_v3 = vld [vmem:[#allocation2 + $0x68] sm:$0xff]  ;;  %v62_v4 = vld [vmem:[#allocation2 + $0x60] sm:$0xff]  ;;  %v159_v5 = vld [vmem:[#allocation5 + $0x78] sm:$0xff]  ;;  %s439_s8 = smov [#allocation7]  }
  0x1e   :  { %325 = vmatprep.subr.mxu1 %v437_v0  ;;  %357 = vmatprep.mubr.msk.f32.mxu1 %vm438_vm0, %v437_v0  ;;  %v61_v6 = vld [vmem:[#allocation2 + $0x58] sm:$0xff]  ;;  %v158_v7 = vld [vmem:[#allocation5 + $0x70] sm:$0xff]  ;;  %v157_v8 = vld [vmem:[#allocation5 + $0x68] sm:$0xff]  ;;  %s244_s9 = sshll.u32 %s439_s8, 4  ;;  %s245_s9 = int_to_ptr.vmem [resolvable:$true] %s244_s9 }
  0x1f   :  { %291 = vmatpush3.msra.mxu0 %v65_v1  ;;  %326 = vmatpush3.msra.mxu1 %v159_v5  ;;  %v60_v9 = vld [vmem:[#allocation2 + $0x50] sm:$0xff]  ;;  %v156_v10 = vld [vmem:[#allocation5 + $0x60] sm:$0xff]  ;;  %v59_v11 = vld [vmem:[#allocation2 + $0x48] sm:$0xff]  ;;  %s407_s10 = scalar_lea.vmem %s245_s9, 128  ;;  %p412_p11 = scmp.lt.s32.totalorder %s245_s9, %s245_s9 }
  0x20   :  { %292 = vmatprep.subr.mxu0 %v437_v0  ;;  %327 = vmatprep.subr.mxu1 %v437_v0  ;;  %v155_v12 = vld [vmem:[#allocation5 + $0x58] sm:$0xff]  ;;  %v58_v13 = vld [vmem:[#allocation2 + $0x40] sm:$0xff]  ;;  %v154_v14 = vld [vmem:[#allocation5 + $0x50] sm:$0xff]  ;;  %p408_p10 = scmp.ne.s32.totalorder %s245_s9, %s407_s10  ;;  %p413_p12 = scmp.lt.s32.totalorder %s407_s10, %s407_s10 }
  0x21   :  { %293 = vmatpush3.msra.mxu0 %v64_v2  ;;  %328 = vmatpush3.msra.mxu1 %v158_v7  ;;  %v57_v15 = vld [vmem:[#allocation2 + $0x38] sm:$0xff]  ;;  %v153_v16 = vld [vmem:[#allocation5 + $0x48] sm:$0xff]  ;;  %v56_v17 = vld [vmem:[#allocation2 + $0x30] sm:$0xff] }
  0x22   :  { %294 = vmatprep.subr.mxu0 %v437_v0  ;;  %329 = vmatprep.subr.mxu1 %v437_v0  ;;  %v152_v18 = vld [vmem:[#allocation5 + $0x40] sm:$0xff]  ;;  %v55_v19 = vld [vmem:[#allocation2 + $0x28] sm:$0xff]  ;;  %v151_v20 = vld [vmem:[#allocation5 + $0x38] sm:$0xff]  ;;  %p414_p13 = por %p413_p12, %p412_p11 }
  0x23   :  { %295 = vmatpush3.msra.mxu0 %v63_v3  ;;  %330 = vmatpush3.msra.mxu1 %v157_v8  ;;  %v54_v21 = vld [vmem:[#allocation2 + $0x20] sm:$0xff]  ;;  %v150_v22 = vld [vmem:[#allocation5 + $0x30] sm:$0xff]  ;;  %v53_v23 = vld [vmem:[#allocation2 + $0x18] sm:$0xff] }
  0x24   :  { %296 = vmatprep.subr.mxu0 %v437_v0  ;;  %331 = vmatprep.subr.mxu1 %v437_v0  ;;  %v149_v24 = vld [vmem:[#allocation5 + $0x28] sm:$0xff]  ;;  %v52_v25 = vld [vmem:[#allocation2 + $0x10] sm:$0xff]  ;;  %v148_v26 = vld [vmem:[#allocation5 + $0x20] sm:$0xff]  ;;  %p415_p0 = pnand %p414_p13, %p408_p10 }
  0x25   :  { %297 = vmatpush3.msra.mxu0 %v62_v4  ;;  %332 = vmatpush3.msra.mxu1 %v156_v10  ;;  %v51_v27 = vld [vmem:[#allocation2 + $0x8] sm:$0xff]  ;;  %v147_v28 = vld [vmem:[#allocation5 + $0x18] sm:$0xff]  ;;  %v50_v29 = vld [vmem:[#allocation2] sm:$0xff] }
  0x26   :  { %298 = vmatprep.subr.mxu0 %v437_v0  ;;  %333 = vmatprep.subr.mxu1 %v437_v0  ;;  %v49_v30 = vld [vmem:[%s522_s0] sm:$0xff]  ;;  %v146_v31 = vld [vmem:[#allocation5 + $0x10] sm:$0xff]  ;;  %v145_v32 = vld [vmem:[#allocation5 + $0x8] sm:$0xff] }
  0x27   :  { %299 = vmatpush3.msra.mxu0 %v61_v6  ;;  %334 = vmatpush3.msra.mxu1 %v155_v12  ;;  %v144_v33 = vld [vmem:[#allocation5] sm:$0xff] }
  0x28   :  { %300 = vmatprep.subr.mxu0 %v437_v0  ;;  %335 = vmatprep.subr.mxu1 %v437_v0  ;;  %v254_v34 = vld [vmem:[%s524_s2] ss:$0 sm:$0xff] }
  0x29   :  { %301 = vmatpush3.msra.mxu0 %v60_v9  ;;  %336 = vmatpush3.msra.mxu1 %v154_v14  ;;  %v255_v39 = vld [vmem:[%s526_s4] ss:$0 sm:$0xff] }
  0x2a   :  { %302 = vmatprep.subr.mxu0 %v437_v0  ;;  %337 = vmatprep.subr.mxu1 %v437_v0 }
  0x2b   :  { %303 = vmatpush3.msra.mxu0 %v59_v11  ;;  %338 = vmatpush3.msra.mxu1 %v153_v16 }
  0x2c   :  { %304 = vmatprep.subr.mxu0 %v437_v0  ;;  %339 = vmatprep.subr.mxu1 %v437_v0 }
  0x2d   :  { %305 = vmatpush3.msra.mxu0 %v58_v13  ;;  %340 = vmatpush3.msra.mxu1 %v152_v18 }
  0x2e   :  { %306 = vmatprep.subr.mxu0 %v437_v0  ;;  %341 = vmatprep.subr.mxu1 %v437_v0 }
  0x2f   :  { %307 = vmatpush3.msra.mxu0 %v57_v15  ;;  %342 = vmatpush3.msra.mxu1 %v151_v20 }
  0x30   :  { %308 = vmatprep.subr.mxu0 %v437_v0  ;;  %343 = vmatprep.subr.mxu1 %v437_v0 }
  0x31   :  { %309 = vmatpush3.msra.mxu0 %v56_v17  ;;  %344 = vmatpush3.msra.mxu1 %v150_v22 }
  0x32   :  { %310 = vmatprep.subr.mxu0 %v437_v0  ;;  %345 = vmatprep.subr.mxu1 %v437_v0 }
  0x33   :  { %311 = vmatpush3.msra.mxu0 %v55_v19  ;;  %346 = vmatpush3.msra.mxu1 %v149_v24 }
  0x34   :  { %312 = vmatprep.subr.mxu0 %v437_v0  ;;  %347 = vmatprep.subr.mxu1 %v437_v0 }
  0x35   :  { %313 = vmatpush3.msra.mxu0 %v54_v21  ;;  %348 = vmatpush3.msra.mxu1 %v148_v26 }
  0x36   :  { %314 = vmatprep.subr.mxu0 %v437_v0  ;;  %349 = vmatprep.subr.mxu1 %v437_v0 }
  0x37   :  { %315 = vmatpush3.msra.mxu0 %v53_v23  ;;  %350 = vmatpush3.msra.mxu1 %v147_v28 }
  0x38   :  { %316 = vmatprep.subr.mxu0 %v437_v0  ;;  %351 = vmatprep.subr.mxu1 %v437_v0 }
  0x39   :  { %317 = vmatpush3.msra.mxu0 %v52_v25  ;;  %352 = vmatpush3.msra.mxu1 %v146_v31 }
  0x3a   :  { %318 = vmatprep.subr.mxu0 %v437_v0  ;;  %353 = vmatprep.subr.mxu1 %v437_v0 }
  0x3b   :  { %319 = vmatpush3.msra.mxu0 %v51_v27  ;;  %354 = vmatpush3.msra.mxu1 %v145_v32 }
  0x3c   :  { %320 = vmatprep.subr.mxu0 %v437_v0  ;;  %355 = vmatprep.subr.mxu1 %v437_v0 }
  0x3d   :  { %321 = vmatpush3.msra.mxu0 %v50_v29  ;;  %356 = vmatpush3.msra.mxu1 %v144_v33 }
  0x3e   :  { %323 = vmatmul.mubr.f32.vlgmr.msra.gmra.mxu0 %v49_v30 }
  0xfe   :  { %v139_v35 = vpop.f32.mrf.mxu0 }
  0xff   :  { %v140_v36 = vadd.f32 %v254_v34, %v139_v35 }
 0x100   :  { %v324_v37 = vpop.f32.mrf.mxu0 }
 0x101   :  { %v143_v38 = vmax.f32 %v140_v36, 0.0 }
 0x103   :  { %358 = vmatmul.mubr.f32.vlgmr.msra.gmra.mxu1 %v143_v38 }
 0x1c3   :  { %v233_v40 = vpop.f32.mrf.mxu1 }
 0x1c4   :  { %v234_v41 = vadd.f32 %v255_v39, %v233_v40 }
 0x1c5   :  { %v359_v42 = vpop.f32.mrf.mxu1 }
 0x1c6   :  { %237 = vst [vmem:[#allocation7] sm:$0xff] %v234_v41 }
 0x1c7   :  { %418 = shalt.err (!%p415_p0)
}
 0x1c8   :  { %247 = dma.vmem_to_hbm [thread:$0]  %s245_s9, 128, %s527_s5, [#allocation4]  }
 0x1c9   :  { %431 = dma.done.wait [#allocation4], 128  }
 0x1ca   :  { %432 = vsyncadd [#allocation4], 4294967168 }
 0x1cb   :  { %251 = vsyncpa [#allocation3], 1 }
 0x1cc   :  { %252 = vsyncpa [#allocation6], 1 }
 0x1cd   :  { %253 = vsyncpa [#allocation4], 1 }

</bundles_post_ra>
